<compile_context>
chip_gen: v7x
topology: tpu7x:2x2x1
jax: 0.10.0
libtpu: 0.0.40
codegen_flags: <defaults>
</compile_context>

<pallas_src>
import functools

import jax
import jax.numpy as jnp
from jax.experimental import pallas as pl
from jax.experimental.pallas import tpu as pltpu

HIDDEN = 64
TILE_R = 512                      # output-row block of A_hat per grid step
TILE_K = 512                      # contraction (neighbor) block (multiple of 256)
FUSED_MAX_N_PAD = 2048            # A_hat bf16 <= 8 MiB -> keep resident, one call
VMEM_LIMIT = 48 * 1024 * 1024     # > all scoped defaults, < v7x's 64 MiB physical


def _round_up(x, m):
    return (x + m - 1) // m * m


# ----------------------------------------------------------------------------
# Fused small-N kernel: both GCN layers + relu + masked mean-pool sum in one
# grid-less pallas_call.  A_hat stays resident in VMEM -> read from HBM once.
# Output is the (1, H) sum over valid node rows of H2; 1/N scale and the fc
# projection happen in the wrapper (they are O(H * C), negligible).
# ----------------------------------------------------------------------------
def _fused_kernel(a_ref, x_ref, w1_ref, b1_ref, w2_ref, b2_ref, o_ref, *,
                  num_nodes):
    a = a_ref[...]                                                   # bf16, resident
    xw = jnp.dot(x_ref[...], w1_ref[...], preferred_element_type=jnp.float32)
    h1 = jnp.maximum(
        jnp.dot(a, xw.astype(jnp.bfloat16), preferred_element_type=jnp.float32)
        + b1_ref[...], 0.0).astype(jnp.bfloat16)
    hw = jnp.dot(h1, w2_ref[...], preferred_element_type=jnp.float32)
    h2 = jnp.maximum(
        jnp.dot(a, hw.astype(jnp.bfloat16), preferred_element_type=jnp.float32)
        + b2_ref[...], 0.0)                                          # (n_pad, H) f32
    row_ids = jax.lax.broadcasted_iota(jnp.int32, (h2.shape[0], 1), 0)
    h2 = jnp.where(row_ids < num_nodes, h2, 0.0)                     # drop padded rows
    o_ref[...] = jnp.sum(h2, axis=0, keepdims=True)                  # (1, H) pool sum


def _fused_forward(a_pad, x_pad, w1_bf, b1, w2_bf, b2, *, num_nodes):
    h = w1_bf.shape[1]
    kernel = functools.partial(_fused_kernel, num_nodes=num_nodes)
    return pl.pallas_call(
        kernel,
        out_shape=jax.ShapeDtypeStruct((1, h), jnp.float32),
        compiler_params=pltpu.CompilerParams(vmem_limit_bytes=VMEM_LIMIT),
    )(a_pad, x_pad, w1_bf, b1, w2_bf, b2)


# ----------------------------------------------------------------------------
# Tiled path, kernel A: feature projection  XW = X @ W  (done once per layer,
# hoisted out of the (row, k) aggregation grid).  Row-parallel.
# ----------------------------------------------------------------------------
def _project_kernel(x_ref, w_ref, o_ref):
    o_ref[...] = jnp.dot(x_ref[...], w_ref[...],
                         preferred_element_type=jnp.float32).astype(o_ref.dtype)


def _project(x, w):
    n_pad, f = x.shape
    h = w.shape[1]
    return pl.pallas_call(
        _project_kernel,
        out_shape=jax.ShapeDtypeStruct((n_pad, h), jnp.bfloat16),
        grid_spec=pltpu.PrefetchScalarGridSpec(
            num_scalar_prefetch=0,
            grid=(n_pad // TILE_R,),
            in_specs=[
                pl.BlockSpec((TILE_R, f), lambda i: (i, 0)),
                pl.BlockSpec((f, h), lambda i: (0, 0)),
            ],
            out_specs=pl.BlockSpec((TILE_R, h), lambda i: (i, 0)),
        ),
        compiler_params=pltpu.CompilerParams(
            dimension_semantics=("parallel",),
            vmem_limit_bytes=VMEM_LIMIT,
        ),
    )(x, w)


# ----------------------------------------------------------------------------
# Tiled path, kernel B: H = relu(A_hat @ XW + b).
# grid = (row blocks, k blocks) of A_hat; row axis "parallel", k axis reduces
# into a VMEM f32 accumulator with pl.when init/finalize.
# ----------------------------------------------------------------------------
def _gcn_relu_kernel(a_ref, xw_ref, b_ref, o_ref, acc_ref):
    k = pl.program_id(1)

    @pl.when(k == 0)
    def _():
        acc_ref[...] = jnp.zeros_like(acc_ref)

    acc_ref[...] += jnp.dot(a_ref[...], xw_ref[...],
                            preferred_element_type=jnp.float32)

    @pl.when(k == pl.num_programs(1) - 1)
    def _():
        o_ref[...] = jnp.maximum(acc_ref[...] + b_ref[...], 0.0).astype(o_ref.dtype)


def _gcn_relu(a, xw, b):
    n_pad = a.shape[0]
    h = xw.shape[1]
    return pl.pallas_call(
        _gcn_relu_kernel,
        out_shape=jax.ShapeDtypeStruct((n_pad, h), jnp.bfloat16),
        grid_spec=pltpu.PrefetchScalarGridSpec(
            num_scalar_prefetch=0,
            grid=(n_pad // TILE_R, n_pad // TILE_K),
            in_specs=[
                pl.BlockSpec((TILE_R, TILE_K), lambda i, k: (i, k)),  # A_hat (streamed)
                pl.BlockSpec((TILE_K, h), lambda i, k: (k, 0)),       # XW rows of k block
                pl.BlockSpec((1, h), lambda i, k: (0, 0)),            # bias (resident)
            ],
            out_specs=pl.BlockSpec((TILE_R, h), lambda i, k: (i, 0)),
            scratch_shapes=[pltpu.VMEM((TILE_R, h), jnp.float32)],
        ),
        compiler_params=pltpu.CompilerParams(
            dimension_semantics=("parallel", "arbitrary"),
            vmem_limit_bytes=VMEM_LIMIT,
        ),
    )(a, xw, b)


# ----------------------------------------------------------------------------
# Tiled path, kernel C: second GCN layer fused with the masked pool reduction.
# Emits an independent (8, H) partial-sum block per row block (row 0 carries
# the partial, rows 1..7 are zero) so the row axis stays "parallel" (v7x 2-TC).
# The wrapper sums the partials, scales by 1/N and applies fc.
# ----------------------------------------------------------------------------
def _gcn_relu_pool_kernel(a_ref, hw_ref, b_ref, o_ref, acc_ref, *, num_nodes):
    i = pl.program_id(0)
    k = pl.program_id(1)
    tile_r = acc_ref.shape[0]

    @pl.when(k == 0)
    def _():
        acc_ref[...] = jnp.zeros_like(acc_ref)

    acc_ref[...] += jnp.dot(a_ref[...], hw_ref[...],
                            preferred_element_type=jnp.float32)

    @pl.when(k == pl.num_programs(1) - 1)
    def _():
        h2 = jnp.maximum(acc_ref[...] + b_ref[...], 0.0)              # (TILE_R, H) f32
        row_ids = i * tile_r + jax.lax.broadcasted_iota(jnp.int32, (tile_r, 1), 0)
        h2 = jnp.where(row_ids < num_nodes, h2, 0.0)                  # drop padded rows
        part = jnp.sum(h2, axis=0, keepdims=True)                     # (1, H) partial sum
        sub = jax.lax.broadcasted_iota(jnp.int32, o_ref.shape, 0)
        o_ref[...] = jnp.where(sub == 0, part, 0.0)                   # row 0 = partial


def _gcn_relu_pool(a, hw, b, *, num_nodes):
    n_pad = a.shape[0]
    h = hw.shape[1]
    nrb = n_pad // TILE_R
    kernel = functools.partial(_gcn_relu_pool_kernel, num_nodes=num_nodes)
    return pl.pallas_call(
        kernel,
        out_shape=jax.ShapeDtypeStruct((nrb * 8, h), jnp.float32),
        grid_spec=pltpu.PrefetchScalarGridSpec(
            num_scalar_prefetch=0,
            grid=(nrb, n_pad // TILE_K),
            in_specs=[
                pl.BlockSpec((TILE_R, TILE_K), lambda i, k: (i, k)),  # A_hat (streamed)
                pl.BlockSpec((TILE_K, h), lambda i, k: (k, 0)),       # H1@W2 rows of k block
                pl.BlockSpec((1, h), lambda i, k: (0, 0)),            # bias (resident)
            ],
            out_specs=pl.BlockSpec((8, h), lambda i, k: (i, 0)),
            scratch_shapes=[pltpu.VMEM((TILE_R, h), jnp.float32)],
        ),
        compiler_params=pltpu.CompilerParams(
            dimension_semantics=("parallel", "arbitrary"),
            vmem_limit_bytes=VMEM_LIMIT,
        ),
    )(a, hw, b)


# ----------------------------------------------------------------------------
# Jitted forward wrapper.  `a_pad` is already padded + bf16 (built once by
# gcn_normalized_adjacency, no extra O(N^2) pad/cast passes here).
# ----------------------------------------------------------------------------
@functools.partial(jax.jit, static_argnames=("num_nodes", "force_tiled"))
def gnn_forward(a_pad, x, params, num_nodes, force_tiled=False):
    w1, b1, w2, b2, wf, bf = params
    n_pad = a_pad.shape[0]
    f = x.shape[1]
    f_pad = _round_up(f, 128)                     # lane-dense feature dim (O(N*F), cheap)

    x_pad = jnp.pad(x, ((0, n_pad - num_nodes), (0, f_pad - f))).astype(jnp.bfloat16)
    w1_bf = jnp.pad(w1, ((0, f_pad - f), (0, 0))).astype(jnp.bfloat16)
    w2_bf = w2.astype(jnp.bfloat16)

    if (not force_tiled) and n_pad <= FUSED_MAX_N_PAD:
        # A_hat fits in VMEM: single pass over A, single launch.
        pooled_sum = _fused_forward(a_pad, x_pad, w1_bf, b1, w2_bf, b2,
                                    num_nodes=num_nodes)
    else:
        assert n_pad % TILE_R == 0 and n_pad % TILE_K == 0
        xw = _project(x_pad, w1_bf)                               # (n_pad, H) bf16
        h1 = _gcn_relu(a_pad, xw, b1)                             # relu(A @ XW + b1)
        hw = _project(h1, w2_bf)                                  # (n_pad, H) bf16
        partials = _gcn_relu_pool(a_pad, hw, b2, num_nodes=num_nodes)
        pooled_sum = jnp.sum(partials, axis=0, keepdims=True)     # (1, H)

    pooled = pooled_sum * (1.0 / num_nodes)                       # global_mean_pool
    return pooled @ wf + bf                                       # (1, num_classes)


# ----------------------------------------------------------------------------
# Plain-JAX glue: normalized dense adjacency from edge_index (PyG gcn_norm),
# scattered directly into an (n_pad, n_pad) buffer and cast once.
# ----------------------------------------------------------------------------
def gcn_normalized_adjacency(edge_index, num_nodes, n_pad=None, dtype=jnp.float32):
    n_pad = num_nodes if n_pad is None else n_pad
    self_loops = jnp.arange(num_nodes, dtype=edge_index.dtype)
    row = jnp.concatenate([edge_index[0], self_loops])   # source nodes
    col = jnp.concatenate([edge_index[1], self_loops])   # target nodes
    ew = jnp.ones(row.shape[0], dtype=jnp.float32)

    deg = jnp.zeros((num_nodes,), jnp.float32).at[col].add(ew)
    deg_inv_sqrt = jnp.where(deg > 0, 1.0 / jnp.sqrt(deg), 0.0)
    norm = deg_inv_sqrt[row] * deg_inv_sqrt[col] * ew

    # (A_hat @ X)[i] = sum_{edge (j -> i)} norm * X[j]; padded rows/cols stay 0.
    a_hat = jnp.zeros((n_pad, n_pad), jnp.float32).at[col, row].add(norm)
    return a_hat.astype(dtype)


def init_params(key, num_node_features, num_classes, hidden=HIDDEN):
    k1, k2, k3 = jax.random.split(key, 3)

    def glorot(k, fan_in, fan_out):
        limit = jnp.sqrt(6.0 / (fan_in + fan_out))
        return jax.random.uniform(k, (fan_in, fan_out), jnp.float32, -limit, limit)

    w1 = glorot(k1, num_node_features, hidden)
    b1 = jnp.zeros((1, hidden), jnp.float32)
    w2 = glorot(k2, hidden, hidden)
    b2 = jnp.zeros((1, hidden), jnp.float32)
    wf = glorot(k3, hidden, num_classes)
    bf = jnp.zeros((1, num_classes), jnp.float32)
    return (w1, b1, w2, b2, wf, bf)


def reference_forward(a_hat, x, params):
    w1, b1, w2, b2, wf, bf = params
    h = jnp.maximum(a_hat @ (x @ w1) + b1, 0.0)
    h = jnp.maximum(a_hat @ (h @ w2) + b2, 0.0)
    pooled = jnp.mean(h, axis=0, keepdims=True)
    return pooled @ wf + bf


def reference_forward_bf16(a_hat, x, params):
    # Mirrors the kernels' bf16 MXU operands (f32 accumulation everywhere).
    w1, b1, w2, b2, wf, bf = params
    bt = jnp.bfloat16
    a = a_hat.astype(bt)
    xw = jnp.dot(x.astype(bt), w1.astype(bt), preferred_element_type=jnp.float32)
    h1 = jnp.maximum(jnp.dot(a, xw.astype(bt), preferred_element_type=jnp.float32) + b1,
                     0.0).astype(bt)
    hw = jnp.dot(h1, w2.astype(bt), preferred_element_type=jnp.float32)
    h2 = jnp.maximum(jnp.dot(a, hw.astype(bt), preferred_element_type=jnp.float32) + b2, 0.0)
    pooled = jnp.mean(h2, axis=0, keepdims=True)
    return pooled @ wf + bf


if __name__ == "__main__":
    NUM_NODES = 200          # deliberately not a tile multiple: exercises pad/mask path
    NUM_NODE_FEATURES = 8
    NUM_CLASSES = 4
    NUM_EDGES = 800

    key = jax.random.PRNGKey(0)
    kx, ke, kp = jax.random.split(key, 3)

    x = jax.random.normal(kx, (NUM_NODES, NUM_NODE_FEATURES), jnp.float32)
    edge_index = jax.random.randint(ke, (2, NUM_EDGES), 0, NUM_NODES, jnp.int32)
    params = init_params(kp, NUM_NODE_FEATURES, NUM_CLASSES)

    # Single graph (batch = zeros) -> global_mean_pool reduces over all nodes.
    a_f32 = gcn_normalized_adjacency(edge_index, NUM_NODES, NUM_NODES, jnp.float32)

    # --- fused small-N path (A_hat resident in VMEM, one pallas_call) ---
    n_pad_fused = _round_up(NUM_NODES, 256)
    a_fused = gcn_normalized_adjacency(edge_index, NUM_NODES, n_pad_fused, jnp.bfloat16)
    out_fused = jax.block_until_ready(
        gnn_forward(a_fused, x, params, NUM_NODES))

    # --- tiled large-N path (forced here to validate the streaming kernels) ---
    n_pad_tiled = _round_up(NUM_NODES, max(TILE_R, TILE_K))
    a_tiled = gcn_normalized_adjacency(edge_index, NUM_NODES, n_pad_tiled, jnp.bfloat16)
    out_tiled = jax.block_until_ready(
        gnn_forward(a_tiled, x, params, NUM_NODES, force_tiled=True))

    ref_bf16 = reference_forward_bf16(a_f32, x, params)   # same bf16/f32-acc recipe
    ref_f32 = reference_forward(a_f32, x, params)          # pure f32 reference

    for out in (out_fused, out_tiled):
        assert out.shape == (1, NUM_CLASSES), out.shape
        assert jnp.allclose(out, ref_bf16, atol=2e-3, rtol=2e-3), (out, ref_bf16)
        assert jnp.allclose(out, ref_f32, atol=5e-2, rtol=5e-2), (out, ref_f32)
    assert jnp.allclose(out_fused, out_tiled, atol=2e-3, rtol=2e-3), (out_fused, out_tiled)

    print("KERNEL_OK")
</pallas_src>

<mosaic_0001>
module attributes {stable_mosaic.version = 11 : i64} {
  func.func @_fused_kernel(%arg0: memref<256x256xbf16, #tpu.memory_space<vmem>>, %arg1: memref<256x128xbf16, #tpu.memory_space<vmem>>, %arg2: memref<128x64xbf16, #tpu.memory_space<vmem>>, %arg3: memref<1x64xf32, #tpu.memory_space<vmem>>, %arg4: memref<64x64xbf16, #tpu.memory_space<vmem>>, %arg5: memref<1x64xf32, #tpu.memory_space<vmem>>, %arg6: memref<1x64xf32, #tpu.memory_space<vmem>>) attributes {dimension_semantics = [], scalar_prefetch = 0 : i64, scratch_operands = 0 : i64, tpu.core_type = #tpu.core_type<tc>} {
    %c0 = arith.constant 0 : index
    %c0_0 = arith.constant 0 : index
    %0 = vector.load %arg0[%c0, %c0_0] : memref<256x256xbf16, #tpu.memory_space<vmem>>, vector<256x256xbf16>
    %c0_1 = arith.constant 0 : index
    %c0_2 = arith.constant 0 : index
    %1 = vector.load %arg1[%c0_1, %c0_2] : memref<256x128xbf16, #tpu.memory_space<vmem>>, vector<256x128xbf16>
    %c0_3 = arith.constant 0 : index
    %c0_4 = arith.constant 0 : index
    %2 = vector.load %arg2[%c0_3, %c0_4] : memref<128x64xbf16, #tpu.memory_space<vmem>>, vector<128x64xbf16>
    %cst = arith.constant dense<0.000000e+00> : vector<256x64xf32>
    %3 = tpu.matmul %1, %2, %cst {dimension_numbers = #tpu.dot_dimension_numbers<[1], [0], [0], [1], [0, 0, 1, 1], [], []>} : vector<256x128xbf16>, vector<128x64xbf16>, vector<256x64xf32> -> vector<256x64xf32>
    %4 = arith.truncf %3 : vector<256x64xf32> to vector<256x64xbf16>
    %cst_5 = arith.constant dense<0.000000e+00> : vector<256x64xf32>
    %5 = tpu.matmul %0, %4, %cst_5 {dimension_numbers = #tpu.dot_dimension_numbers<[1], [0], [0], [1], [0, 0, 1, 1], [], []>} : vector<256x256xbf16>, vector<256x64xbf16>, vector<256x64xf32> -> vector<256x64xf32>
    %c0_6 = arith.constant 0 : index
    %c0_7 = arith.constant 0 : index
    %6 = vector.load %arg3[%c0_6, %c0_7] : memref<1x64xf32, #tpu.memory_space<vmem>>, vector<1x64xf32>
    %7 = vector.broadcast %6 : vector<1x64xf32> to vector<256x64xf32>
    %8 = arith.addf %5, %7 : vector<256x64xf32>
    %cst_8 = arith.constant 0.000000e+00 : f32
    %9 = vector.broadcast %cst_8 : f32 to vector<256x64xf32>
    %10 = arith.maximumf %8, %9 : vector<256x64xf32>
    %11 = arith.truncf %10 : vector<256x64xf32> to vector<256x64xbf16>
    %c0_9 = arith.constant 0 : index
    %c0_10 = arith.constant 0 : index
    %12 = vector.load %arg4[%c0_9, %c0_10] : memref<64x64xbf16, #tpu.memory_space<vmem>>, vector<64x64xbf16>
    %cst_11 = arith.constant dense<0.000000e+00> : vector<256x64xf32>
    %13 = tpu.matmul %11, %12, %cst_11 {dimension_numbers = #tpu.dot_dimension_numbers<[1], [0], [0], [1], [0, 0, 1, 1], [], []>} : vector<256x64xbf16>, vector<64x64xbf16>, vector<256x64xf32> -> vector<256x64xf32>
    %14 = arith.truncf %13 : vector<256x64xf32> to vector<256x64xbf16>
    %cst_12 = arith.constant dense<0.000000e+00> : vector<256x64xf32>
    %15 = tpu.matmul %0, %14, %cst_12 {dimension_numbers = #tpu.dot_dimension_numbers<[1], [0], [0], [1], [0, 0, 1, 1], [], []>} : vector<256x256xbf16>, vector<256x64xbf16>, vector<256x64xf32> -> vector<256x64xf32>
    %c0_13 = arith.constant 0 : index
    %c0_14 = arith.constant 0 : index
    %16 = vector.load %arg5[%c0_13, %c0_14] : memref<1x64xf32, #tpu.memory_space<vmem>>, vector<1x64xf32>
    %17 = vector.broadcast %16 : vector<1x64xf32> to vector<256x64xf32>
    %18 = arith.addf %15, %17 : vector<256x64xf32>
    %cst_15 = arith.constant 0.000000e+00 : f32
    %19 = vector.broadcast %cst_15 : f32 to vector<256x64xf32>
    %20 = arith.maximumf %18, %19 : vector<256x64xf32>
    %21 = tpu.iota {dimensions = array<i32: 0>} : vector<256x1xi32>
    %c200_i32 = arith.constant 200 : i32
    %22 = vector.broadcast %c200_i32 : i32 to vector<256x1xi32>
    %23 = arith.cmpi slt, %21, %22 : vector<256x1xi32>
    %cst_16 = arith.constant 0.000000e+00 : f32
    %24 = vector.shape_cast %23 : vector<256x1xi1> to vector<256x1xi1>
    %25 = vector.broadcast %24 : vector<256x1xi1> to vector<256x64xi1>
    %26 = vector.broadcast %cst_16 : f32 to vector<256x64xf32>
    %27 = arith.select %25, %20, %26 : vector<256x64xi1>, vector<256x64xf32>
    %cst_17 = arith.constant dense<0.000000e+00> : vector<64xf32>
    %28 = vector.multi_reduction <add>, %27, %cst_17 [0] : vector<256x64xf32> to vector<64xf32>
    %29 = vector.shape_cast %28 : vector<64xf32> to vector<1x64xf32>
    %c0_18 = arith.constant 0 : index
    %c0_19 = arith.constant 0 : index
    %30 = vector.load %arg6[%c0_18, %c0_19] : memref<1x64xf32, #tpu.memory_space<vmem>>, vector<1x64xf32>
    tpu.vector_store %arg6[%c0_18, %c0_19], %29 {strides = array<i32>} : memref<1x64xf32, #tpu.memory_space<vmem>>, vector<1x64xf32>,
    return
  }
}

</mosaic_0001>

<bundles_post_ra>
// kernel: gnn_forward.1
= control target key start
LH: loop header
LB: loop body
LE: loop exit
PB: predicated region body
PF: predicated region fallthrough
CT: control target
= control target key end

     0   :  { %vm833_vm0 = vcmask 523264   ;;  %vm1489_vm1 = vcmask 516096   ;;  %s2459_s2 = inlined_call_operand.vmem [shape: bf16[128,64], index: 2, kind: input, shape index: {}]   ;;  %s2460_s1 = inlined_call_operand.vmem [shape: bf16[256,128], index: 1, kind: input, shape index: {}]   ;;  %s2461_s0 = inlined_call_operand.vmem [shape: bf16[256,256], index: 0, kind: input, shape index: {}]   ;;  %s2462_s4 = inlined_call_operand.vmem [shape: bf16[64,64], index: 4, kind: input, shape index: {}]   ;;  %s2463_s3 = inlined_call_operand.vmem [shape: f32[1,64], index: 3, kind: input, shape index: {}]   ;;  %s2464_s5 = inlined_call_operand.vmem [shape: f32[1,64], index: 5, kind: input, shape index: {}]   ;;  %s2465_s6 = inlined_call_operand.vmem [shape: f32[1,64], index: 6, kind: output, shape index: {}]  }
   0x1   :  { %v1929_v0 = vld [vmem:[%s2459_s2] sm:$0xff]   ;;  %v1930_v1 = vld [vmem:[%s2459_s2 + $0x8] sm:$0xff]   ;;  %v1931_v2 = vld [vmem:[%s2459_s2 + $0x10] sm:$0xff]  }
   0x2   :  { %1841 = vmatprep.subr.bf16.mxu1 %v1929_v0  ;;  %v1932_v3 = vld [vmem:[%s2459_s2 + $0x18] sm:$0xff]   ;;  %v1937_v4 = vld [vmem:[%s2460_s1] sm:$0xff]   ;;  %v1934_v6 = vld [vmem:[%s2459_s2 + $0x28] sm:$0xff]  }
   0x3   :  { %1842 = vmatpush3.bf16.msra.mxu1 %v1929_v0  ;;  %1857 = vmatprep.mubr.bf16.mxu1 %v1937_v4  ;;  %v1933_v5 = vld [vmem:[%s2459_s2 + $0x20] sm:$0xff]   ;;  %v1935_v7 = vld [vmem:[%s2459_s2 + $0x30] sm:$0xff]   ;;  %v1936_v8 = vld [vmem:[%s2459_s2 + $0x38] sm:$0xff]  }
   0x4   :  { %1843 = vmatprep.subr.bf16.mxu1 %v1930_v1  ;;  %v1938_v9 = vld [vmem:[%s2460_s1 + $0x8] sm:$0xff]   ;;  %v1939_v10 = vld [vmem:[%s2460_s1 + $0x10] sm:$0xff]   ;;  %v1940_v11 = vld [vmem:[%s2460_s1 + $0x18] sm:$0xff]  }
   0x5   :  { %v1941_v12 = vld [vmem:[%s2460_s1 + $0x20] sm:$0xff]   ;;  %v1942_v13 = vld [vmem:[%s2460_s1 + $0x28] sm:$0xff]   ;;  %v1943_v14 = vld [vmem:[%s2460_s1 + $0x30] sm:$0xff]  }
   0x6   :  { %v1944_v15 = vld [vmem:[%s2460_s1 + $0x38] sm:$0xff]   ;;  %v1945_v16 = vld [vmem:[%s2460_s1 + $0x40] sm:$0xff]   ;;  %v1946_v17 = vld [vmem:[%s2460_s1 + $0x48] sm:$0xff]  }
   0x7   :  { %1844 = vmatpush3.bf16.msra.mxu1 %v1930_v1  ;;  %v1947_v18 = vld [vmem:[%s2460_s1 + $0x50] sm:$0xff]   ;;  %v1948_v19 = vld [vmem:[%s2460_s1 + $0x58] sm:$0xff]   ;;  %v1949_v20 = vld [vmem:[%s2460_s1 + $0x60] sm:$0xff]  }
   0x8   :  { %1845 = vmatprep.subr.bf16.mxu1 %v1931_v2  ;;  %v1950_v21 = vld [vmem:[%s2460_s1 + $0x68] sm:$0xff]   ;;  %v1951_v22 = vld [vmem:[%s2460_s1 + $0x70] sm:$0xff]   ;;  %v1952_v23 = vld [vmem:[%s2460_s1 + $0x78] sm:$0xff]  }
   0x9   :  { %v2115_v24 = vld [vmem:[%s2461_s0 + $0x4] ss:$8 sps:$4 sm:$0xff]  }
   0xb   :  { %1846 = vmatpush3.bf16.msra.mxu1 %v1931_v2 }
   0xc   :  { %1847 = vmatprep.subr.bf16.mxu1 %v1932_v3 }
   0xf   :  { %1848 = vmatpush3.bf16.msra.mxu1 %v1932_v3 }
  0x10   :  { %1849 = vmatprep.subr.bf16.mxu1 %v1933_v5 }
  0x13   :  { %1850 = vmatpush3.bf16.msra.mxu1 %v1933_v5 }
  0x14   :  { %1851 = vmatprep.subr.bf16.mxu1 %v1934_v6 }
  0x17   :  { %1852 = vmatpush3.bf16.msra.mxu1 %v1934_v6 }
  0x18   :  { %1853 = vmatprep.subr.bf16.mxu1 %v1935_v7 }
  0x1b   :  { %1854 = vmatpush3.bf16.msra.mxu1 %v1935_v7 }
  0x1c   :  { %1855 = vmatprep.subr.bf16.mxu1 %v1936_v8 }
  0x1f   :  { %1856 = vmatpush3.bf16.msra.mxu1 %v1936_v8 }
  0x22   :  { %1858 = vmatmul.mubr.bf16.vlgmr.msra.gmra.mrb[0].mxu1 %v1938_v9  ;;  %v2121_v9 = vld [vmem:[%s2461_s0] ss:$8 sps:$4 sm:$0xff]  }
  0x23   :  { %1861 = vmatprep.mubr.bf16.mxu1 %v1939_v10  ;;  %v2126_v10 = vld [vmem:[%s2461_s0 + $0x14] ss:$8 sps:$4 sm:$0xff]  }
  0x2a   :  { %1862 = vmatmul.mubr.bf16.gmra.mrb[4].mxu1 %v1940_v11  ;;  %v2133_v11 = vld [vmem:[%s2461_s0 + $0x10] ss:$8 sps:$4 sm:$0xff]  }
  0x2b   :  { %1865 = vmatprep.mubr.bf16.mxu1 %v1941_v12  ;;  %v2138_v12 = vld [vmem:[%s2461_s0 + $0x24] ss:$8 sps:$4 sm:$0xff]  }
  0x32   :  { %1866 = vmatmul.mubr.bf16.gmra.mrb[8].mxu1 %v1942_v13  ;;  %v2145_v13 = vld [vmem:[%s2461_s0 + $0x20] ss:$8 sps:$4 sm:$0xff]  }
  0x33   :  { %1869 = vmatprep.mubr.bf16.mxu1 %v1943_v14  ;;  %v2150_v14 = vld [vmem:[%s2461_s0 + $0x34] ss:$8 sps:$4 sm:$0xff]  }
  0x3a   :  { %1870 = vmatmul.mubr.bf16.gmra.mrb[12].mxu1 %v1944_v15  ;;  %v2157_v15 = vld [vmem:[%s2461_s0 + $0x30] ss:$8 sps:$4 sm:$0xff]  }
  0x3b   :  { %1873 = vmatprep.mubr.bf16.mxu1 %v1945_v16  ;;  %v2162_v16 = vld [vmem:[%s2461_s0 + $0x44] ss:$8 sps:$4 sm:$0xff]  }
  0x42   :  { %1874 = vmatmul.mubr.bf16.gmra.mrb[16].mxu1 %v1946_v17  ;;  %v2169_v17 = vld [vmem:[%s2461_s0 + $0x40] ss:$8 sps:$4 sm:$0xff]  }
  0x43   :  { %1877 = vmatprep.mubr.bf16.mxu1 %v1947_v18  ;;  %v2174_v18 = vld [vmem:[%s2461_s0 + $0x54] ss:$8 sps:$4 sm:$0xff]  }
  0x4a   :  { %1878 = vmatmul.mubr.bf16.gmra.mrb[20].mxu1 %v1948_v19  ;;  %v2181_v19 = vld [vmem:[%s2461_s0 + $0x50] ss:$8 sps:$4 sm:$0xff]  }
  0x4b   :  { %1881 = vmatprep.mubr.bf16.mxu1 %v1949_v20  ;;  %v2186_v20 = vld [vmem:[%s2461_s0 + $0x64] ss:$8 sps:$4 sm:$0xff]  }
  0x52   :  { %1882 = vmatmul.mubr.bf16.gmra.mrb[24].mxu1 %v1950_v21  ;;  %v2193_v21 = vld [vmem:[%s2461_s0 + $0x60] ss:$8 sps:$4 sm:$0xff]  }
  0x53   :  { %1885 = vmatprep.mubr.bf16.mxu1 %v1951_v22  ;;  %v2198_v22 = vld [vmem:[%s2461_s0 + $0x74] ss:$8 sps:$4 sm:$0xff]  }
  0x5a   :  { %1886 = vmatmul.mubr.bf16.gmra.mrb[28].mxu1 %v1952_v23  ;;  %v2205_v23 = vld [vmem:[%s2461_s0 + $0x70] ss:$8 sps:$4 sm:$0xff]  }
  0x5b   :  { %624 = vmatprep.mubr.bf16.mxu1 %v2115_v24 }
  0xf5   :  { %v1859_v25 = vpop.f32.mrb[0].mxu1 }
  0xf6   :  { %v282_v26 = vpop.f32.mrb[1].mxu1 }
  0xf7   :  { %v1860_v27 = vpop.f32.mrb[2].mxu1 }
  0xf8   :  { %v410_v28 = vpack.c.bf16 %v1860_v27, %v1859_v25  ;;  %v285_v29 = vpop.f32.mrb[3].mxu1  ;;  %v2210_v25 = vld [vmem:[%s2461_s0 + $0x84] ss:$8 sps:$4 sm:$0xff]   ;;  %v2222_v27 = vld [vmem:[%s2461_s0 + $0x94] ss:$8 sps:$4 sm:$0xff]  }
  0xf9   :  { %v409_v30 = vpack.c.bf16 %v285_v29, %v282_v26  ;;  %v2217_v26 = vld [vmem:[%s2461_s0 + $0x80] ss:$8 sps:$4 sm:$0xff]   ;;  %v2234_v29 = vld [vmem:[%s2461_s0 + $0xa4] ss:$8 sps:$4 sm:$0xff]  }
  0xfd   :  { %v1863_v31 = vpop.f32.mrb[4].mxu1 }
  0xfe   :  { %v298_v32 = vpop.f32.mrb[5].mxu1 }
  0xff   :  { %v1864_v33 = vpop.f32.mrb[6].mxu1 }
 0x100   :  { %v412_v34 = vpack.c.bf16 %v1864_v33, %v1863_v31  ;;  %v301_v35 = vpop.f32.mrb[7].mxu1  ;;  %v2246_v31 = vld [vmem:[%s2461_s0 + $0xb4] ss:$8 sps:$4 sm:$0xff]   ;;  %v2258_v33 = vld [vmem:[%s2461_s0 + $0xc4] ss:$8 sps:$4 sm:$0xff]  }
 0x101   :  { %v411_v36 = vpack.c.bf16 %v301_v35, %v298_v32  ;;  %v2253_v32 = vld [vmem:[%s2461_s0 + $0xb0] ss:$8 sps:$4 sm:$0xff]   ;;  %v2002_v35 = vld [vmem:[%s2462_s4 + $0x8] sm:$0xff]  }
 0x105   :  { %v1867_v37 = vpop.f32.mrb[8].mxu1 }
 0x106   :  { %v314_v38 = vpop.f32.mrb[9].mxu1 }
 0x107   :  { %v1868_v39 = vpop.f32.mrb[10].mxu1 }
 0x108   :  { %v414_v40 = vpack.c.bf16 %v1868_v39, %v1867_v37  ;;  %v317_v41 = vpop.f32.mrb[11].mxu1  ;;  %v2276_v37 = vld [vmem:[%s2461_s0 + $0xd4] ss:$8 sps:$4 sm:$0xff]  }
 0x109   :  { %v413_v42 = vpack.c.bf16 %v317_v41, %v314_v38  ;;  %v2003_v38 = vld [vmem:[%s2462_s4 + $0x10] sm:$0xff]   ;;  %v2004_v39 = vld [vmem:[%s2462_s4 + $0x18] sm:$0xff]   ;;  %v2294_v41 = vld [vmem:[%s2461_s0 + $0xe4] ss:$8 sps:$4 sm:$0xff]  }
 0x10d   :  { %v1871_v43 = vpop.f32.mrb[12].mxu1 }
 0x10e   :  { %v330_v44 = vpop.f32.mrb[13].mxu1 }
 0x10f   :  { %v1872_v45 = vpop.f32.mrb[14].mxu1 }
 0x110   :  { %v416_v46 = vpack.c.bf16 %v1872_v45, %v1871_v43  ;;  %v333_v47 = vpop.f32.mrb[15].mxu1  ;;  %v2306_v43 = vld [vmem:[%s2461_s0 + $0xf4] ss:$8 sps:$4 sm:$0xff]  }
 0x111   :  { %v415_v48 = vpack.c.bf16 %v333_v47, %v330_v44  ;;  %v2313_v44 = vld [vmem:[%s2461_s0 + $0xf0] ss:$8 sps:$4 sm:$0xff]  }
 0x115   :  { %v1875_v49 = vpop.f32.mrb[16].mxu1 }
 0x116   :  { %v346_v50 = vpop.f32.mrb[17].mxu1 }
 0x117   :  { %v1876_v51 = vpop.f32.mrb[18].mxu1 }
 0x118   :  { %v418_v52 = vpack.c.bf16 %v1876_v51, %v1875_v49  ;;  %v349_v53 = vpop.f32.mrb[19].mxu1 }
 0x119   :  { %v417_v54 = vpack.c.bf16 %v349_v53, %v346_v50 }
 0x11b   :  { %1597 = vmatprep.subr.bf16.mxu1 %v417_v54 }
 0x11c   :  { %1598 = vmatpush3.bf16.msra.mxu1 %v409_v30  ;;  %v2241_v30 = vld [vmem:[%s2461_s0 + $0xa0] ss:$8 sps:$4 sm:$0xff]  }
 0x11d   :  { %v1879_v55 = vpop.f32.mrb[20].mxu1  ;;  %1599 = vmatprep.subr.bf16.mxu1 %v418_v52 }
 0x11e   :  { %v362_v56 = vpop.f32.mrb[21].mxu1 }
 0x11f   :  { %v1880_v57 = vpop.f32.mrb[22].mxu1 }
 0x120   :  { %v420_v58 = vpack.c.bf16 %v1880_v57, %v1879_v55  ;;  %v365_v59 = vpop.f32.mrb[23].mxu1  ;;  %1600 = vmatpush3.bf16.msra.mxu1 %v410_v28  ;;  %v2229_v28 = vld [vmem:[%s2461_s0 + $0x90] ss:$8 sps:$4 sm:$0xff]  }
 0x121   :  { %v419_v60 = vpack.c.bf16 %v365_v59, %v362_v56 }
 0x123   :  { %1601 = vmatprep.subr.bf16.mxu1 %v419_v60 }
 0x124   :  { %1602 = vmatpush3.bf16.msra.mxu1 %v411_v36  ;;  %v2271_v36 = vld [vmem:[%s2461_s0 + $0xc0] ss:$8 sps:$4 sm:$0xff]  }
 0x125   :  { %v1883_v61 = vpop.f32.mrb[24].mxu1  ;;  %1603 = vmatprep.subr.bf16.mxu1 %v420_v58 }
 0x126   :  { %v378_v62 = vpop.f32.mrb[25].mxu1 }
 0x127   :  { %v1884_v63 = vpop.f32.mrb[26].mxu1 }
 0x128   :  { %v422_v0 = vpack.c.bf16 %v1884_v63, %v1883_v61  ;;  %v381_v1 = vpop.f32.mrb[27].mxu1  ;;  %1604 = vmatpush3.bf16.msra.mxu1 %v412_v34  ;;  %v2001_v34 = vld [vmem:[%s2462_s4] sm:$0xff]  }
 0x129   :  { %v421_v2 = vpack.c.bf16 %v381_v1, %v378_v62  ;;  %1889 = vmatprep.subr.bf16.mxu0 %v2001_v34 }
 0x12a   :  { %1890 = vmatpush3.bf16.msra.mxu0 %v2001_v34 }
 0x12b   :  { %1605 = vmatprep.subr.bf16.mxu1 %v421_v2  ;;  %1891 = vmatprep.subr.bf16.mxu0 %v2002_v35 }
 0x12c   :  { %1606 = vmatpush3.bf16.msra.mxu1 %v413_v42  ;;  %v2301_v42 = vld [vmem:[%s2461_s0 + $0xe0] ss:$8 sps:$4 sm:$0xff]  }
 0x12d   :  { %v1887_v3 = vpop.f32.mrb[28].mxu1  ;;  %1607 = vmatprep.subr.bf16.mxu1 %v422_v0 }
 0x12e   :  { %v394_v4 = vpop.f32.mrb[29].mxu1  ;;  %1892 = vmatpush3.bf16.msra.mxu0 %v2002_v35 }
 0x12f   :  { %v1888_v5 = vpop.f32.mrb[30].mxu1  ;;  %1893 = vmatprep.subr.bf16.mxu0 %v2003_v38 }
 0x130   :  { %v424_v6 = vpack.c.bf16 %v1888_v5, %v1887_v3  ;;  %v397_v7 = vpop.f32.mrb[31].mxu1  ;;  %1608 = vmatpush3.bf16.msra.mxu1 %v414_v40  ;;  %v2289_v40 = vld [vmem:[%s2461_s0 + $0xd0] ss:$8 sps:$4 sm:$0xff]  }
 0x131   :  { %v423_v8 = vpack.c.bf16 %v397_v7, %v394_v4 }
 0x132   :  { %1894 = vmatpush3.bf16.msra.mxu0 %v2003_v38 }
 0x133   :  { %1609 = vmatprep.subr.bf16.mxu1 %v423_v8  ;;  %1895 = vmatprep.subr.bf16.mxu0 %v2004_v39 }
 0x134   :  { %1610 = vmatpush3.bf16.msra.mxu1 %v415_v48 }
 0x135   :  { %1611 = vmatprep.subr.bf16.mxu1 %v424_v6 }
 0x136   :  { %1896 = vmatpush3.bf16.msra.mxu0 %v2004_v39 }
 0x138   :  { %1612 = vmatpush3.bf16.msra.mxu1 %v416_v46  ;;  %v2319_v46 = vld [vmem:[%s2463_s3] ss:$0 sm:$0xff] }
 0x13b   :  { %625 = vmatmul.mubr.bf16.vlgmr.msra.gmra.mrb[32].mxu1 %v2121_v9 }
 0x13c   :  { %632 = vmatprep.mubr.bf16.mxu1 %v2126_v10 }
 0x143   :  { %633 = vmatmul.mubr.bf16.gmra.mrb[36].mxu1 %v2133_v11 }
 0x144   :  { %640 = vmatprep.mubr.bf16.mxu1 %v2138_v12 }
 0x14b   :  { %641 = vmatmul.mubr.bf16.gmra.mrb[40].mxu1 %v2145_v13 }
 0x14c   :  { %648 = vmatprep.mubr.bf16.mxu1 %v2150_v14 }
 0x153   :  { %649 = vmatmul.mubr.bf16.gmra.mrb[44].mxu1 %v2157_v15 }
 0x154   :  { %656 = vmatprep.mubr.bf16.mxu1 %v2162_v16 }
 0x15b   :  { %657 = vmatmul.mubr.bf16.gmra.mrb[48].mxu1 %v2169_v17 }
 0x15c   :  { %664 = vmatprep.mubr.bf16.mxu1 %v2174_v18 }
 0x163   :  { %665 = vmatmul.mubr.bf16.gmra.mrb[52].mxu1 %v2181_v19 }
 0x164   :  { %672 = vmatprep.mubr.bf16.mxu1 %v2186_v20 }
 0x16b   :  { %673 = vmatmul.mubr.bf16.gmra.mrb[56].mxu1 %v2193_v21 }
 0x16c   :  { %680 = vmatprep.mubr.bf16.mxu1 %v2198_v22 }
 0x173   :  { %681 = vmatmul.mubr.bf16.gmra.mrb[60].mxu1 %v2205_v23 }
 0x174   :  { %688 = vmatprep.mubr.bf16.mxu1 %v2210_v25 }
 0x17b   :  { %689 = vmatmul.mubr.bf16.gmra.mrb[64].mxu1 %v2217_v26 }
 0x17c   :  { %696 = vmatprep.mubr.bf16.mxu1 %v2222_v27 }
 0x183   :  { %697 = vmatmul.mubr.bf16.gmra.mrb[68].mxu1 %v2229_v28 }
 0x184   :  { %704 = vmatprep.mubr.bf16.mxu1 %v2234_v29 }
 0x18b   :  { %705 = vmatmul.mubr.bf16.gmra.mrb[72].mxu1 %v2241_v30 }
 0x18c   :  { %712 = vmatprep.mubr.bf16.mxu1 %v2246_v31 }
 0x193   :  { %713 = vmatmul.mubr.bf16.gmra.mrb[76].mxu1 %v2253_v32 }
 0x194   :  { %720 = vmatprep.mubr.bf16.mxu1 %v2258_v33 }
 0x19b   :  { %721 = vmatmul.mubr.bf16.gmra.mrb[80].mxu1 %v2271_v36 }
 0x19c   :  { %728 = vmatprep.mubr.bf16.mxu1 %v2276_v37 }
 0x1a3   :  { %729 = vmatmul.mubr.bf16.gmra.mrb[84].mxu1 %v2289_v40 }
 0x1a4   :  { %736 = vmatprep.mubr.bf16.mxu1 %v2294_v41 }
 0x1ab   :  { %737 = vmatmul.mubr.bf16.gmra.mrb[88].mxu1 %v2301_v42 }
 0x1ac   :  { %744 = vmatprep.mubr.bf16.mxu1 %v2306_v43 }
 0x1b3   :  { %745 = vmatmul.mubr.bf16.gmra.mrb[92].mxu1 %v2313_v44 }
 0x20e   :  { %v1613_v45 = vpop.f32.mrb[32].mxu1 }
 0x20f   :  { %v1614_v47 = vpop.f32.mrb[33].mxu1 }
 0x210   :  { %v1615_v48 = vadd.f32 %v1614_v47, %v1613_v45  ;;  %v1616_v49 = vpop.f32.mrb[34].mxu1 }
 0x211   :  { %v1617_v50 = vpop.f32.mrb[35].mxu1 }
 0x212   :  { %v627_v51 = vadd.f32 %v1615_v48, %v2319_v46  ;;  %v1618_v52 = vadd.f32 %v1617_v50, %v1616_v49 }
 0x214   :  { %v630_v53 = vadd.f32 %v1618_v52, %v2319_v46  ;;  %v753_v54 = vmax.f32 %v627_v51, 0.0 }
 0x216   :  { %v754_v55 = vmax.f32 %v630_v53, 0.0  ;;  %v1619_v56 = vpop.f32.mrb[36].mxu1 }
 0x217   :  { %v1620_v57 = vpop.f32.mrb[37].mxu1 }
 0x218   :  { %v1621_v58 = vadd.f32 %v1620_v57, %v1619_v56  ;;  %v1622_v59 = vpop.f32.mrb[38].mxu1  ;;  %v785_v60 = vpack.c.bf16 %v754_v55, %v753_v54 }
 0x219   :  { %v1623_v61 = vpop.f32.mrb[39].mxu1 }
 0x21a   :  { %v635_v62 = vadd.f32 %v1621_v58, %v2319_v46  ;;  %v1624_v63 = vadd.f32 %v1623_v61, %v1622_v59  ;;  %1897 = vmatprep.mubr.msk.bf16.mxu0 %vm833_vm0, %v785_v60 }
 0x21c   :  { %v638_v0 = vadd.f32 %v1624_v63, %v2319_v46  ;;  %v755_v1 = vmax.f32 %v635_v62, 0.0 }
 0x21e   :  { %v756_v2 = vmax.f32 %v638_v0, 0.0  ;;  %v1625_v3 = vpop.f32.mrb[40].mxu1 }
 0x21f   :  { %v1626_v4 = vpop.f32.mrb[41].mxu1 }
 0x220   :  { %v786_v5 = vpack.c.bf16 %v756_v2, %v755_v1  ;;  %v1627_v6 = vadd.f32 %v1626_v4, %v1625_v3  ;;  %v1628_v7 = vpop.f32.mrb[42].mxu1 }
 0x221   :  { %v1629_v8 = vpop.f32.mrb[43].mxu1 }
 0x222   :  { %v643_v34 = vadd.f32 %v1627_v6, %v2319_v46  ;;  %1898 = vmatmul.mubr.msk.bf16.vlgmr.msra.gmra.mrb[0].mxu0 %vm833_vm0, %v786_v5  ;;  %v1630_v35 = vadd.f32 %v1629_v8, %v1628_v7 }
 0x224   :  { %v646_v38 = vadd.f32 %v1630_v35, %v2319_v46  ;;  %v757_v39 = vmax.f32 %v643_v34, 0.0 }
 0x226   :  { %v758_v45 = vmax.f32 %v646_v38, 0.0  ;;  %v1631_v47 = vpop.f32.mrb[44].mxu1 }
 0x227   :  { %v1632_v48 = vpop.f32.mrb[45].mxu1 }
 0x228   :  { %v787_v49 = vpack.c.bf16 %v758_v45, %v757_v39  ;;  %v1633_v50 = vadd.f32 %v1632_v48, %v1631_v47  ;;  %v1634_v51 = vpop.f32.mrb[46].mxu1 }
 0x229   :  { %v1635_v52 = vpop.f32.mrb[47].mxu1 }
 0x22a   :  { %v651_v53 = vadd.f32 %v1633_v50, %v2319_v46  ;;  %v1636_v54 = vadd.f32 %v1635_v52, %v1634_v51  ;;  %1901 = vmatprep.mubr.msk.bf16.mxu0 %vm833_vm0, %v787_v49 }
 0x22c   :  { %v654_v55 = vadd.f32 %v1636_v54, %v2319_v46  ;;  %v759_v56 = vmax.f32 %v651_v53, 0.0 }
 0x22e   :  { %v760_v57 = vmax.f32 %v654_v55, 0.0  ;;  %v1637_v58 = vpop.f32.mrb[48].mxu1 }
 0x22f   :  { %v1638_v59 = vpop.f32.mrb[49].mxu1 }
 0x230   :  { %v788_v60 = vpack.c.bf16 %v760_v57, %v759_v56  ;;  %v1639_v61 = vadd.f32 %v1638_v59, %v1637_v58  ;;  %v1640_v62 = vpop.f32.mrb[50].mxu1 }
 0x231   :  { %v1641_v63 = vpop.f32.mrb[51].mxu1 }
 0x232   :  { %v659_v0 = vadd.f32 %v1639_v61, %v2319_v46  ;;  %1902 = vmatmul.mubr.msk.bf16.gmra.mrb[4].mxu0 %vm833_vm0, %v788_v60  ;;  %v1642_v1 = vadd.f32 %v1641_v63, %v1640_v62 }
 0x234   :  { %v662_v2 = vadd.f32 %v1642_v1, %v2319_v46  ;;  %v761_v3 = vmax.f32 %v659_v0, 0.0 }
 0x236   :  { %v762_v4 = vmax.f32 %v662_v2, 0.0  ;;  %v1643_v5 = vpop.f32.mrb[52].mxu1 }
 0x237   :  { %v1644_v6 = vpop.f32.mrb[53].mxu1 }
 0x238   :  { %v789_v7 = vpack.c.bf16 %v762_v4, %v761_v3  ;;  %v1645_v8 = vadd.f32 %v1644_v6, %v1643_v5  ;;  %v1646_v34 = vpop.f32.mrb[54].mxu1 }
 0x239   :  { %v1647_v35 = vpop.f32.mrb[55].mxu1 }
 0x23a   :  { %v667_v38 = vadd.f32 %v1645_v8, %v2319_v46  ;;  %v1648_v39 = vadd.f32 %v1647_v35, %v1646_v34  ;;  %1905 = vmatprep.mubr.msk.bf16.mxu0 %vm833_vm0, %v789_v7 }
 0x23c   :  { %v670_v45 = vadd.f32 %v1648_v39, %v2319_v46  ;;  %v763_v47 = vmax.f32 %v667_v38, 0.0 }
 0x23e   :  { %v764_v48 = vmax.f32 %v670_v45, 0.0  ;;  %v1649_v49 = vpop.f32.mrb[56].mxu1 }
 0x23f   :  { %v1650_v50 = vpop.f32.mrb[57].mxu1 }
 0x240   :  { %v790_v51 = vpack.c.bf16 %v764_v48, %v763_v47  ;;  %v1651_v52 = vadd.f32 %v1650_v50, %v1649_v49  ;;  %v1652_v53 = vpop.f32.mrb[58].mxu1 }
 0x241   :  { %v1653_v54 = vpop.f32.mrb[59].mxu1 }
 0x242   :  { %v675_v55 = vadd.f32 %v1651_v52, %v2319_v46  ;;  %v1654_v56 = vadd.f32 %v1653_v54, %v1652_v53  ;;  %1906 = vmatmul.mubr.msk.bf16.gmra.mrb[8].mxu0 %vm833_vm0, %v790_v51 }
 0x244   :  { %v678_v57 = vadd.f32 %v1654_v56, %v2319_v46  ;;  %v765_v58 = vmax.f32 %v675_v55, 0.0 }
 0x246   :  { %v766_v59 = vmax.f32 %v678_v57, 0.0  ;;  %v1655_v60 = vpop.f32.mrb[60].mxu1 }
 0x247   :  { %v1656_v61 = vpop.f32.mrb[61].mxu1 }
 0x248   :  { %v791_v62 = vpack.c.bf16 %v766_v59, %v765_v58  ;;  %v1657_v63 = vadd.f32 %v1656_v61, %v1655_v60  ;;  %v1658_v0 = vpop.f32.mrb[62].mxu1 }
 0x249   :  { %v1659_v1 = vpop.f32.mrb[63].mxu1 }
 0x24a   :  { %v683_v2 = vadd.f32 %v1657_v63, %v2319_v46  ;;  %v1660_v3 = vadd.f32 %v1659_v1, %v1658_v0  ;;  %1909 = vmatprep.mubr.msk.bf16.mxu0 %vm833_vm0, %v791_v62 }
 0x24c   :  { %v686_v4 = vadd.f32 %v1660_v3, %v2319_v46  ;;  %v767_v5 = vmax.f32 %v683_v2, 0.0 }
 0x24e   :  { %v768_v6 = vmax.f32 %v686_v4, 0.0  ;;  %v1661_v7 = vpop.f32.mrb[64].mxu1 }
 0x24f   :  { %v1662_v8 = vpop.f32.mrb[65].mxu1 }
 0x250   :  { %v792_v34 = vpack.c.bf16 %v768_v6, %v767_v5  ;;  %v1663_v35 = vadd.f32 %v1662_v8, %v1661_v7  ;;  %v1664_v38 = vpop.f32.mrb[66].mxu1 }
 0x251   :  { %v1665_v39 = vpop.f32.mrb[67].mxu1 }
 0x252   :  { %v691_v45 = vadd.f32 %v1663_v35, %v2319_v46  ;;  %v1666_v47 = vadd.f32 %v1665_v39, %v1664_v38  ;;  %1910 = vmatmul.mubr.msk.bf16.gmra.mrb[12].mxu0 %vm833_vm0, %v792_v34 }
 0x254   :  { %v694_v48 = vadd.f32 %v1666_v47, %v2319_v46  ;;  %v769_v49 = vmax.f32 %v691_v45, 0.0 }
 0x256   :  { %v770_v50 = vmax.f32 %v694_v48, 0.0  ;;  %v1667_v51 = vpop.f32.mrb[68].mxu1 }
 0x257   :  { %v1668_v52 = vpop.f32.mrb[69].mxu1 }
 0x258   :  { %v793_v53 = vpack.c.bf16 %v770_v50, %v769_v49  ;;  %v1669_v54 = vadd.f32 %v1668_v52, %v1667_v51  ;;  %v1670_v55 = vpop.f32.mrb[70].mxu1 }
 0x259   :  { %v1671_v56 = vpop.f32.mrb[71].mxu1 }
 0x25a   :  { %v699_v57 = vadd.f32 %v1669_v54, %v2319_v46  ;;  %v1672_v58 = vadd.f32 %v1671_v56, %v1670_v55  ;;  %1913 = vmatprep.mubr.msk.bf16.mxu0 %vm833_vm0, %v793_v53 }
 0x25c   :  { %v702_v59 = vadd.f32 %v1672_v58, %v2319_v46  ;;  %v771_v60 = vmax.f32 %v699_v57, 0.0 }
 0x25e   :  { %v772_v61 = vmax.f32 %v702_v59, 0.0  ;;  %v1673_v62 = vpop.f32.mrb[72].mxu1 }
 0x25f   :  { %v1674_v63 = vpop.f32.mrb[73].mxu1 }
 0x260   :  { %v794_v0 = vpack.c.bf16 %v772_v61, %v771_v60  ;;  %v1675_v1 = vadd.f32 %v1674_v63, %v1673_v62  ;;  %v1676_v2 = vpop.f32.mrb[74].mxu1 }
 0x261   :  { %v1677_v3 = vpop.f32.mrb[75].mxu1 }
 0x262   :  { %1914 = vmatmul.mubr.msk.bf16.gmra.mrb[16].mxu0 %vm833_vm0, %v794_v0  ;;  %v707_v4 = vadd.f32 %v1675_v1, %v2319_v46  ;;  %v1678_v5 = vadd.f32 %v1677_v3, %v1676_v2 }
 0x264   :  { %v710_v6 = vadd.f32 %v1678_v5, %v2319_v46  ;;  %v773_v7 = vmax.f32 %v707_v4, 0.0 }
 0x266   :  { %v774_v8 = vmax.f32 %v710_v6, 0.0  ;;  %v1679_v34 = vpop.f32.mrb[76].mxu1 }
 0x267   :  { %v1680_v35 = vpop.f32.mrb[77].mxu1 }
 0x268   :  { %v795_v38 = vpack.c.bf16 %v774_v8, %v773_v7  ;;  %v1681_v39 = vadd.f32 %v1680_v35, %v1679_v34  ;;  %v1682_v45 = vpop.f32.mrb[78].mxu1 }
 0x269   :  { %v1683_v47 = vpop.f32.mrb[79].mxu1 }
 0x26a   :  { %v715_v48 = vadd.f32 %v1681_v39, %v2319_v46  ;;  %v1684_v49 = vadd.f32 %v1683_v47, %v1682_v45  ;;  %1917 = vmatprep.mubr.msk.bf16.mxu0 %vm833_vm0, %v795_v38 }
 0x26c   :  { %v718_v50 = vadd.f32 %v1684_v49, %v2319_v46  ;;  %v775_v51 = vmax.f32 %v715_v48, 0.0 }
 0x26e   :  { %v776_v52 = vmax.f32 %v718_v50, 0.0  ;;  %v1685_v53 = vpop.f32.mrb[80].mxu1 }
 0x26f   :  { %v1686_v54 = vpop.f32.mrb[81].mxu1 }
 0x270   :  { %v796_v55 = vpack.c.bf16 %v776_v52, %v775_v51  ;;  %v1687_v56 = vadd.f32 %v1686_v54, %v1685_v53  ;;  %v1688_v57 = vpop.f32.mrb[82].mxu1 }
 0x271   :  { %v1689_v58 = vpop.f32.mrb[83].mxu1 }
 0x272   :  { %1918 = vmatmul.mubr.msk.bf16.gmra.mrb[20].mxu0 %vm833_vm0, %v796_v55  ;;  %v723_v59 = vadd.f32 %v1687_v56, %v2319_v46  ;;  %v1690_v60 = vadd.f32 %v1689_v58, %v1688_v57 }
 0x274   :  { %v726_v61 = vadd.f32 %v1690_v60, %v2319_v46  ;;  %v777_v62 = vmax.f32 %v723_v59, 0.0 }
 0x276   :  { %v778_v63 = vmax.f32 %v726_v61, 0.0  ;;  %v1691_v0 = vpop.f32.mrb[84].mxu1 }
 0x277   :  { %v1692_v1 = vpop.f32.mrb[85].mxu1 }
 0x278   :  { %v797_v2 = vpack.c.bf16 %v778_v63, %v777_v62  ;;  %v1693_v3 = vadd.f32 %v1692_v1, %v1691_v0  ;;  %v1694_v4 = vpop.f32.mrb[86].mxu1 }
 0x279   :  { %v1695_v5 = vpop.f32.mrb[87].mxu1 }
 0x27a   :  { %v731_v6 = vadd.f32 %v1693_v3, %v2319_v46  ;;  %v1696_v7 = vadd.f32 %v1695_v5, %v1694_v4  ;;  %1921 = vmatprep.mubr.msk.bf16.mxu0 %vm833_vm0, %v797_v2 }
 0x27c   :  { %v734_v8 = vadd.f32 %v1696_v7, %v2319_v46  ;;  %v779_v34 = vmax.f32 %v731_v6, 0.0 }
 0x27e   :  { %v780_v35 = vmax.f32 %v734_v8, 0.0  ;;  %v1697_v38 = vpop.f32.mrb[88].mxu1 }
 0x27f   :  { %v1698_v39 = vpop.f32.mrb[89].mxu1 }
 0x280   :  { %v798_v45 = vpack.c.bf16 %v780_v35, %v779_v34  ;;  %v1699_v47 = vadd.f32 %v1698_v39, %v1697_v38  ;;  %v1700_v48 = vpop.f32.mrb[90].mxu1 }
 0x281   :  { %v1701_v49 = vpop.f32.mrb[91].mxu1 }
 0x282   :  { %1922 = vmatmul.mubr.msk.bf16.gmra.mrb[24].mxu0 %vm833_vm0, %v798_v45  ;;  %v739_v50 = vadd.f32 %v1699_v47, %v2319_v46  ;;  %v1702_v51 = vadd.f32 %v1701_v49, %v1700_v48 }
 0x284   :  { %v742_v52 = vadd.f32 %v1702_v51, %v2319_v46  ;;  %v781_v53 = vmax.f32 %v739_v50, 0.0 }
 0x286   :  { %v782_v54 = vmax.f32 %v742_v52, 0.0  ;;  %v1703_v55 = vpop.f32.mrb[92].mxu1 }
 0x287   :  { %v1704_v56 = vpop.f32.mrb[93].mxu1 }
 0x288   :  { %v799_v57 = vpack.c.bf16 %v782_v54, %v781_v53  ;;  %v1705_v58 = vadd.f32 %v1704_v56, %v1703_v55  ;;  %v1706_v59 = vpop.f32.mrb[94].mxu1 }
 0x289   :  { %v1707_v60 = vpop.f32.mrb[95].mxu1 }
 0x28a   :  { %v747_v61 = vadd.f32 %v1705_v58, %v2319_v46  ;;  %v1708_v62 = vadd.f32 %v1707_v60, %v1706_v59  ;;  %1925 = vmatprep.mubr.msk.bf16.mxu0 %vm833_vm0, %v799_v57 }
 0x28c   :  { %v750_v63 = vadd.f32 %v1708_v62, %v2319_v46  ;;  %v783_v0 = vmax.f32 %v747_v61, 0.0 }
 0x28e   :  { %v784_v1 = vmax.f32 %v750_v63, 0.0 }
 0x290   :  { %v800_v2 = vpack.c.bf16 %v784_v1, %v783_v0 }
 0x292   :  { %1926 = vmatmul.mubr.msk.bf16.gmra.mrb[28].mxu0 %vm833_vm0, %v800_v2 }
 0x293   :  { %1098 = vmatprep.mubr.bf16.mxu0 %v2115_v24 }
 0x2f5   :  { %v1899_v3 = vpop.f32.mrb[0].mxu0 }
 0x2f6   :  { %v916_v4 = vpop.f32.mrb[1].mxu0 }
 0x2f7   :  { %v1900_v5 = vpop.f32.mrb[2].mxu0 }
 0x2f8   :  { %v1044_v6 = vpack.c.bf16 %v1900_v5, %v1899_v3  ;;  %v919_v7 = vpop.f32.mrb[3].mxu0 }
 0x2f9   :  { %v1043_v8 = vpack.c.bf16 %v919_v7, %v916_v4 }
 0x305   :  { %v1903_v34 = vpop.f32.mrb[4].mxu0 }
 0x306   :  { %v932_v35 = vpop.f32.mrb[5].mxu0 }
 0x307   :  { %v1904_v38 = vpop.f32.mrb[6].mxu0 }
 0x308   :  { %v1046_v39 = vpack.c.bf16 %v1904_v38, %v1903_v34  ;;  %v935_v45 = vpop.f32.mrb[7].mxu0 }
 0x309   :  { %v1045_v47 = vpack.c.bf16 %v935_v45, %v932_v35 }
 0x315   :  { %v1907_v46 = vpop.f32.mrb[8].mxu0 }
 0x316   :  { %v948_v48 = vpop.f32.mrb[9].mxu0 }
 0x317   :  { %v1908_v49 = vpop.f32.mrb[10].mxu0 }
 0x318   :  { %v1048_v50 = vpack.c.bf16 %v1908_v49, %v1907_v46  ;;  %v951_v51 = vpop.f32.mrb[11].mxu0 }
 0x319   :  { %v1047_v52 = vpack.c.bf16 %v951_v51, %v948_v48 }
 0x325   :  { %v1911_v53 = vpop.f32.mrb[12].mxu0 }
 0x326   :  { %v964_v24 = vpop.f32.mrb[13].mxu0 }
 0x327   :  { %v1912_v54 = vpop.f32.mrb[14].mxu0 }
 0x328   :  { %v1050_v55 = vpack.c.bf16 %v1912_v54, %v1911_v53  ;;  %v967_v56 = vpop.f32.mrb[15].mxu0 }
 0x329   :  { %v1049_v57 = vpack.c.bf16 %v967_v56, %v964_v24 }
 0x335   :  { %v1915_v58 = vpop.f32.mrb[16].mxu0 }
 0x336   :  { %v980_v59 = vpop.f32.mrb[17].mxu0 }
 0x337   :  { %v1916_v60 = vpop.f32.mrb[18].mxu0 }
 0x338   :  { %v1052_v61 = vpack.c.bf16 %v1916_v60, %v1915_v58  ;;  %v983_v62 = vpop.f32.mrb[19].mxu0 }
 0x339   :  { %v1051_v63 = vpack.c.bf16 %v983_v62, %v980_v59 }
 0x33b   :  { %1729 = vmatprep.subr.bf16.mxu0 %v1051_v63 }
 0x33c   :  { %1730 = vmatpush3.bf16.msra.mxu0 %v1043_v8 }
 0x33d   :  { %1731 = vmatprep.subr.bf16.mxu0 %v1052_v61 }
 0x340   :  { %1732 = vmatpush3.bf16.msra.mxu0 %v1044_v6 }
 0x345   :  { %v1919_v0 = vpop.f32.mrb[20].mxu0 }
 0x346   :  { %v996_v1 = vpop.f32.mrb[21].mxu0 }
 0x347   :  { %v1920_v2 = vpop.f32.mrb[22].mxu0 }
 0x348   :  { %v1054_v3 = vpack.c.bf16 %v1920_v2, %v1919_v0  ;;  %v999_v4 = vpop.f32.mrb[23].mxu0 }
 0x349   :  { %v1053_v5 = vpack.c.bf16 %v999_v4, %v996_v1 }
 0x34b   :  { %1733 = vmatprep.subr.bf16.mxu0 %v1053_v5 }
 0x34c   :  { %1734 = vmatpush3.bf16.msra.mxu0 %v1045_v47 }
 0x34d   :  { %1735 = vmatprep.subr.bf16.mxu0 %v1054_v3 }
 0x350   :  { %1736 = vmatpush3.bf16.msra.mxu0 %v1046_v39 }
 0x355   :  { %v1923_v7 = vpop.f32.mrb[24].mxu0 }
 0x356   :  { %v1012_v34 = vpop.f32.mrb[25].mxu0 }
 0x357   :  { %v1924_v35 = vpop.f32.mrb[26].mxu0 }
 0x358   :  { %v1056_v38 = vpack.c.bf16 %v1924_v35, %v1923_v7  ;;  %v1015_v45 = vpop.f32.mrb[27].mxu0 }
 0x359   :  { %v1055_v46 = vpack.c.bf16 %v1015_v45, %v1012_v34 }
 0x35b   :  { %1737 = vmatprep.subr.bf16.mxu0 %v1055_v46 }
 0x35c   :  { %1738 = vmatpush3.bf16.msra.mxu0 %v1047_v52 }
 0x35d   :  { %1739 = vmatprep.subr.bf16.mxu0 %v1056_v38 }
 0x360   :  { %1740 = vmatpush3.bf16.msra.mxu0 %v1048_v50 }
 0x365   :  { %v1927_v6 = vpop.f32.mrb[28].mxu0 }
 0x366   :  { %v1028_v8 = vpop.f32.mrb[29].mxu0 }
 0x367   :  { %v1928_v48 = vpop.f32.mrb[30].mxu0 }
 0x368   :  { %v1058_v49 = vpack.c.bf16 %v1928_v48, %v1927_v6  ;;  %v1031_v51 = vpop.f32.mrb[31].mxu0 }
 0x369   :  { %v1057_v53 = vpack.c.bf16 %v1031_v51, %v1028_v8 }
 0x36b   :  { %1741 = vmatprep.subr.bf16.mxu0 %v1057_v53 }
 0x36c   :  { %1742 = vmatpush3.bf16.msra.mxu0 %v1049_v57 }
 0x36d   :  { %1743 = vmatprep.subr.bf16.mxu0 %v1058_v49 }
 0x370   :  { %1744 = vmatpush3.bf16.msra.mxu0 %v1050_v55 }
 0x373   :  { %1099 = vmatmul.mubr.bf16.vlgmr.msra.gmra.mrb[32].mxu0 %v2121_v9 }
 0x374   :  { %1106 = vmatprep.mubr.bf16.mxu0 %v2126_v10  ;;  %v2404_v10 = vld [vmem:[%s2464_s5] ss:$0 sm:$0xff] }
 0x37b   :  { %1107 = vmatmul.mubr.bf16.gmra.mrb[36].mxu0 %v2133_v11 }
 0x37c   :  { %1114 = vmatprep.mubr.bf16.mxu0 %v2138_v12 }
 0x383   :  { %1115 = vmatmul.mubr.bf16.gmra.mrb[40].mxu0 %v2145_v13 }
 0x384   :  { %1122 = vmatprep.mubr.bf16.mxu0 %v2150_v14 }
 0x38b   :  { %1123 = vmatmul.mubr.bf16.gmra.mrb[44].mxu0 %v2157_v15 }
 0x38c   :  { %1130 = vmatprep.mubr.bf16.mxu0 %v2162_v16 }
 0x393   :  { %1131 = vmatmul.mubr.bf16.gmra.mrb[48].mxu0 %v2169_v17 }
 0x394   :  { %1138 = vmatprep.mubr.bf16.mxu0 %v2174_v18 }
 0x39b   :  { %1139 = vmatmul.mubr.bf16.gmra.mrb[52].mxu0 %v2181_v19 }
 0x39c   :  { %1146 = vmatprep.mubr.bf16.mxu0 %v2186_v20 }
 0x3a3   :  { %1147 = vmatmul.mubr.bf16.gmra.mrb[56].mxu0 %v2193_v21 }
 0x3a4   :  { %1154 = vmatprep.mubr.bf16.mxu0 %v2198_v22 }
 0x3ab   :  { %1155 = vmatmul.mubr.bf16.gmra.mrb[60].mxu0 %v2205_v23 }
 0x3ac   :  { %1162 = vmatprep.mubr.bf16.mxu0 %v2210_v25 }
 0x3b3   :  { %1163 = vmatmul.mubr.bf16.gmra.mrb[64].mxu0 %v2217_v26 }
 0x3b4   :  { %1170 = vmatprep.mubr.bf16.mxu0 %v2222_v27 }
 0x3bb   :  { %1171 = vmatmul.mubr.bf16.gmra.mrb[68].mxu0 %v2229_v28 }
 0x3bc   :  { %1178 = vmatprep.mubr.bf16.mxu0 %v2234_v29 }
 0x3c3   :  { %1179 = vmatmul.mubr.bf16.gmra.mrb[72].mxu0 %v2241_v30 }
 0x3c4   :  { %1186 = vmatprep.mubr.bf16.mxu0 %v2246_v31 }
 0x3cb   :  { %1187 = vmatmul.mubr.bf16.gmra.mrb[76].mxu0 %v2253_v32 }
 0x3cc   :  { %1194 = vmatprep.mubr.bf16.mxu0 %v2258_v33 }
 0x3d3   :  { %1195 = vmatmul.mubr.bf16.gmra.mrb[80].mxu0 %v2271_v36 }
 0x3d4   :  { %1202 = vmatprep.mubr.bf16.mxu0 %v2276_v37 }
 0x3db   :  { %1203 = vmatmul.mubr.bf16.gmra.mrb[84].mxu0 %v2289_v40 }
 0x3dc   :  { %1210 = vmatprep.mubr.bf16.mxu0 %v2294_v41 }
 0x3e3   :  { %1211 = vmatmul.mubr.bf16.gmra.mrb[88].mxu0 %v2301_v42 }
 0x3e4   :  { %1218 = vmatprep.mubr.bf16.mxu0 %v2306_v43 }
 0x3eb   :  { %1219 = vmatmul.mubr.bf16.gmra.mrb[92].mxu0 %v2313_v44 }
 0x446   :  { %v1745_v9 = vpop.f32.mrb[32].mxu0 }
 0x447   :  { %v1746_v11 = vpop.f32.mrb[33].mxu0 }
 0x448   :  { %v1747_v12 = vadd.f32 %v1746_v11, %v1745_v9  ;;  %v1748_v13 = vpop.f32.mrb[34].mxu0 }
 0x449   :  { %v1749_v14 = vpop.f32.mrb[35].mxu0 }
 0x44a   :  { %v1101_v15 = vadd.f32 %v1747_v12, %v2404_v10  ;;  %v1750_v16 = vadd.f32 %v1749_v14, %v1748_v13 }
 0x44c   :  { %v1227_v17 = vmax.f32 %v1101_v15, 0.0  ;;  %v1104_v18 = vadd.f32 %v1750_v16, %v2404_v10 }
 0x44e   :  { %v1228_v19 = vmax.f32 %v1104_v18, 0.0  ;;  %v1751_v20 = vpop.f32.mrb[36].mxu0  ;;  %v1420_v22 = vsel %vm833_vm0, %v1227_v17, 0.0 }
 0x44f   :  { %v1752_v21 = vpop.f32.mrb[37].mxu0 }
 0x450   :  { %v1421_v23 = vsel %vm833_vm0, %v1228_v19, 0.0  ;;  %v1753_v25 = vadd.f32 %v1752_v21, %v1751_v20  ;;  %v1754_v26 = vpop.f32.mrb[38].mxu0 }
 0x451   :  { %v1422_v27 = vadd.f32 %v1421_v23, %v1420_v22  ;;  %v1755_v28 = vpop.f32.mrb[39].mxu0 }
 0x452   :  { %v1109_v29 = vadd.f32 %v1753_v25, %v2404_v10  ;;  %v1756_v30 = vadd.f32 %v1755_v28, %v1754_v26 }
 0x454   :  { %v1229_v31 = vmax.f32 %v1109_v29, 0.0  ;;  %v1112_v32 = vadd.f32 %v1756_v30, %v2404_v10 }
 0x456   :  { %v1423_v33 = vsel %vm833_vm0, %v1229_v31, 0.0  ;;  %v1230_v36 = vmax.f32 %v1112_v32, 0.0  ;;  %v1757_v37 = vpop.f32.mrb[40].mxu0 }
 0x457   :  { %v1424_v40 = vadd.f32 %v1423_v33, %v1422_v27  ;;  %v1758_v41 = vpop.f32.mrb[41].mxu0 }
 0x458   :  { %v1425_v42 = vsel %vm833_vm0, %v1230_v36, 0.0  ;;  %v1759_v43 = vadd.f32 %v1758_v41, %v1757_v37  ;;  %v1760_v44 = vpop.f32.mrb[42].mxu0 }
 0x459   :  { %v1426_v39 = vadd.f32 %v1425_v42, %v1424_v40  ;;  %v1761_v47 = vpop.f32.mrb[43].mxu0 }
 0x45a   :  { %v1117_v50 = vadd.f32 %v1759_v43, %v2404_v10  ;;  %v1762_v52 = vadd.f32 %v1761_v47, %v1760_v44 }
 0x45c   :  { %v1231_v24 = vmax.f32 %v1117_v50, 0.0  ;;  %v1120_v54 = vadd.f32 %v1762_v52, %v2404_v10 }
 0x45e   :  { %v1427_v55 = vsel %vm833_vm0, %v1231_v24, 0.0  ;;  %v1232_v56 = vmax.f32 %v1120_v54, 0.0  ;;  %v1763_v57 = vpop.f32.mrb[44].mxu0 }
 0x45f   :  { %v1428_v58 = vadd.f32 %v1427_v55, %v1426_v39  ;;  %v1764_v59 = vpop.f32.mrb[45].mxu0 }
 0x460   :  { %v1429_v60 = vsel %vm833_vm0, %v1232_v56, 0.0  ;;  %v1765_v61 = vadd.f32 %v1764_v59, %v1763_v57  ;;  %v1766_v62 = vpop.f32.mrb[46].mxu0 }
 0x461   :  { %v1430_v63 = vadd.f32 %v1429_v60, %v1428_v58  ;;  %v1767_v0 = vpop.f32.mrb[47].mxu0 }
 0x462   :  { %v1125_v1 = vadd.f32 %v1765_v61, %v2404_v10  ;;  %v1768_v2 = vadd.f32 %v1767_v0, %v1766_v62 }
 0x464   :  { %v1233_v3 = vmax.f32 %v1125_v1, 0.0  ;;  %v1128_v4 = vadd.f32 %v1768_v2, %v2404_v10 }
 0x466   :  { %v1431_v5 = vsel %vm833_vm0, %v1233_v3, 0.0  ;;  %v1234_v7 = vmax.f32 %v1128_v4, 0.0  ;;  %v1769_v34 = vpop.f32.mrb[48].mxu0 }
 0x467   :  { %v1432_v35 = vadd.f32 %v1431_v5, %v1430_v63  ;;  %v1770_v38 = vpop.f32.mrb[49].mxu0 }
 0x468   :  { %v1433_v45 = vsel %vm833_vm0, %v1234_v7, 0.0  ;;  %v1771_v46 = vadd.f32 %v1770_v38, %v1769_v34  ;;  %v1772_v6 = vpop.f32.mrb[50].mxu0 }
 0x469   :  { %v1434_v8 = vadd.f32 %v1433_v45, %v1432_v35  ;;  %v1773_v48 = vpop.f32.mrb[51].mxu0 }
 0x46a   :  { %v1133_v49 = vadd.f32 %v1771_v46, %v2404_v10  ;;  %v1774_v51 = vadd.f32 %v1773_v48, %v1772_v6 }
 0x46c   :  { %v1235_v53 = vmax.f32 %v1133_v49, 0.0  ;;  %v1136_v9 = vadd.f32 %v1774_v51, %v2404_v10 }
 0x46e   :  { %v1435_v11 = vsel %vm833_vm0, %v1235_v53, 0.0  ;;  %v1236_v12 = vmax.f32 %v1136_v9, 0.0  ;;  %v1775_v13 = vpop.f32.mrb[52].mxu0 }
 0x46f   :  { %v1436_v14 = vadd.f32 %v1435_v11, %v1434_v8  ;;  %v1776_v15 = vpop.f32.mrb[53].mxu0 }
 0x470   :  { %v1437_v16 = vsel %vm833_vm0, %v1236_v12, 0.0  ;;  %v1777_v17 = vadd.f32 %v1776_v15, %v1775_v13  ;;  %v1778_v18 = vpop.f32.mrb[54].mxu0 }
 0x471   :  { %v1438_v19 = vadd.f32 %v1437_v16, %v1436_v14  ;;  %v1779_v20 = vpop.f32.mrb[55].mxu0 }
 0x472   :  { %v1141_v21 = vadd.f32 %v1777_v17, %v2404_v10  ;;  %v1780_v22 = vadd.f32 %v1779_v20, %v1778_v18 }
 0x474   :  { %v1237_v23 = vmax.f32 %v1141_v21, 0.0  ;;  %v1144_v25 = vadd.f32 %v1780_v22, %v2404_v10 }
 0x476   :  { %v1439_v26 = vsel %vm833_vm0, %v1237_v23, 0.0  ;;  %v1238_v27 = vmax.f32 %v1144_v25, 0.0  ;;  %v1781_v28 = vpop.f32.mrb[56].mxu0 }
 0x477   :  { %v1440_v29 = vadd.f32 %v1439_v26, %v1438_v19  ;;  %v1782_v30 = vpop.f32.mrb[57].mxu0 }
 0x478   :  { %v1441_v31 = vsel %vm833_vm0, %v1238_v27, 0.0  ;;  %v1783_v32 = vadd.f32 %v1782_v30, %v1781_v28  ;;  %v1784_v33 = vpop.f32.mrb[58].mxu0 }
 0x479   :  { %v1442_v36 = vadd.f32 %v1441_v31, %v1440_v29  ;;  %v1785_v37 = vpop.f32.mrb[59].mxu0 }
 0x47a   :  { %v1149_v40 = vadd.f32 %v1783_v32, %v2404_v10  ;;  %v1786_v41 = vadd.f32 %v1785_v37, %v1784_v33 }
 0x47c   :  { %v1239_v42 = vmax.f32 %v1149_v40, 0.0  ;;  %v1152_v43 = vadd.f32 %v1786_v41, %v2404_v10 }
 0x47e   :  { %v1443_v44 = vsel %vm833_vm0, %v1239_v42, 0.0  ;;  %v1240_v39 = vmax.f32 %v1152_v43, 0.0  ;;  %v1787_v47 = vpop.f32.mrb[60].mxu0 }
 0x47f   :  { %v1444_v50 = vadd.f32 %v1443_v44, %v1442_v36  ;;  %v1788_v52 = vpop.f32.mrb[61].mxu0 }
 0x480   :  { %v1445_v24 = vsel %vm833_vm0, %v1240_v39, 0.0  ;;  %v1789_v54 = vadd.f32 %v1788_v52, %v1787_v47  ;;  %v1790_v55 = vpop.f32.mrb[62].mxu0 }
 0x481   :  { %v1446_v56 = vadd.f32 %v1445_v24, %v1444_v50  ;;  %v1791_v57 = vpop.f32.mrb[63].mxu0 }
 0x482   :  { %v1157_v58 = vadd.f32 %v1789_v54, %v2404_v10  ;;  %v1792_v59 = vadd.f32 %v1791_v57, %v1790_v55 }
 0x484   :  { %v1241_v60 = vmax.f32 %v1157_v58, 0.0  ;;  %v1160_v61 = vadd.f32 %v1792_v59, %v2404_v10 }
 0x486   :  { %v1447_v62 = vsel %vm833_vm0, %v1241_v60, 0.0  ;;  %v1242_v63 = vmax.f32 %v1160_v61, 0.0  ;;  %v1793_v0 = vpop.f32.mrb[64].mxu0 }
 0x487   :  { %v1448_v1 = vadd.f32 %v1447_v62, %v1446_v56  ;;  %v1794_v2 = vpop.f32.mrb[65].mxu0 }
 0x488   :  { %v1449_v3 = vsel %vm833_vm0, %v1242_v63, 0.0  ;;  %v1795_v4 = vadd.f32 %v1794_v2, %v1793_v0  ;;  %v1796_v5 = vpop.f32.mrb[66].mxu0 }
 0x489   :  { %v1450_v7 = vadd.f32 %v1449_v3, %v1448_v1  ;;  %v1797_v34 = vpop.f32.mrb[67].mxu0 }
 0x48a   :  { %v1165_v35 = vadd.f32 %v1795_v4, %v2404_v10  ;;  %v1798_v38 = vadd.f32 %v1797_v34, %v1796_v5 }
 0x48c   :  { %v1243_v45 = vmax.f32 %v1165_v35, 0.0  ;;  %v1168_v46 = vadd.f32 %v1798_v38, %v2404_v10 }
 0x48e   :  { %v1451_v6 = vsel %vm833_vm0, %v1243_v45, 0.0  ;;  %v1244_v8 = vmax.f32 %v1168_v46, 0.0  ;;  %v1799_v48 = vpop.f32.mrb[68].mxu0 }
 0x48f   :  { %v1452_v49 = vadd.f32 %v1451_v6, %v1450_v7  ;;  %v1800_v51 = vpop.f32.mrb[69].mxu0 }
 0x490   :  { %v1453_v53 = vsel %vm833_vm0, %v1244_v8, 0.0  ;;  %v1801_v9 = vadd.f32 %v1800_v51, %v1799_v48  ;;  %v1802_v11 = vpop.f32.mrb[70].mxu0 }
 0x491   :  { %v1454_v12 = vadd.f32 %v1453_v53, %v1452_v49  ;;  %v1803_v13 = vpop.f32.mrb[71].mxu0 }
 0x492   :  { %v1173_v14 = vadd.f32 %v1801_v9, %v2404_v10  ;;  %v1804_v15 = vadd.f32 %v1803_v13, %v1802_v11 }
 0x494   :  { %v1245_v16 = vmax.f32 %v1173_v14, 0.0  ;;  %v1176_v17 = vadd.f32 %v1804_v15, %v2404_v10 }
 0x496   :  { %v1455_v18 = vsel %vm833_vm0, %v1245_v16, 0.0  ;;  %v1246_v19 = vmax.f32 %v1176_v17, 0.0  ;;  %v1805_v20 = vpop.f32.mrb[72].mxu0 }
 0x497   :  { %v1456_v21 = vadd.f32 %v1455_v18, %v1454_v12  ;;  %v1806_v22 = vpop.f32.mrb[73].mxu0 }
 0x498   :  { %v1457_v23 = vsel %vm833_vm0, %v1246_v19, 0.0  ;;  %v1807_v25 = vadd.f32 %v1806_v22, %v1805_v20  ;;  %v1808_v26 = vpop.f32.mrb[74].mxu0 }
 0x499   :  { %v1458_v27 = vadd.f32 %v1457_v23, %v1456_v21  ;;  %v1809_v28 = vpop.f32.mrb[75].mxu0 }
 0x49a   :  { %v1181_v29 = vadd.f32 %v1807_v25, %v2404_v10  ;;  %v1810_v30 = vadd.f32 %v1809_v28, %v1808_v26 }
 0x49c   :  { %v1247_v31 = vmax.f32 %v1181_v29, 0.0  ;;  %v1184_v32 = vadd.f32 %v1810_v30, %v2404_v10 }
 0x49e   :  { %v1459_v33 = vsel %vm833_vm0, %v1247_v31, 0.0  ;;  %v1248_v36 = vmax.f32 %v1184_v32, 0.0  ;;  %v1811_v37 = vpop.f32.mrb[76].mxu0 }
 0x49f   :  { %v1460_v40 = vadd.f32 %v1459_v33, %v1458_v27  ;;  %v1812_v41 = vpop.f32.mrb[77].mxu0 }
 0x4a0   :  { %v1461_v42 = vsel %vm833_vm0, %v1248_v36, 0.0  ;;  %v1813_v43 = vadd.f32 %v1812_v41, %v1811_v37  ;;  %v1814_v44 = vpop.f32.mrb[78].mxu0 }
 0x4a1   :  { %v1462_v39 = vadd.f32 %v1461_v42, %v1460_v40  ;;  %v1815_v47 = vpop.f32.mrb[79].mxu0 }
 0x4a2   :  { %v1189_v50 = vadd.f32 %v1813_v43, %v2404_v10  ;;  %v1816_v52 = vadd.f32 %v1815_v47, %v1814_v44 }
 0x4a4   :  { %v1249_v24 = vmax.f32 %v1189_v50, 0.0  ;;  %v1192_v54 = vadd.f32 %v1816_v52, %v2404_v10 }
 0x4a6   :  { %v1463_v55 = vsel %vm833_vm0, %v1249_v24, 0.0  ;;  %v1250_v56 = vmax.f32 %v1192_v54, 0.0  ;;  %v1817_v57 = vpop.f32.mrb[80].mxu0 }
 0x4a7   :  { %v1464_v58 = vadd.f32 %v1463_v55, %v1462_v39  ;;  %v1818_v59 = vpop.f32.mrb[81].mxu0 }
 0x4a8   :  { %v1465_v60 = vsel %vm833_vm0, %v1250_v56, 0.0  ;;  %v1819_v61 = vadd.f32 %v1818_v59, %v1817_v57  ;;  %v1820_v62 = vpop.f32.mrb[82].mxu0 }
 0x4a9   :  { %v1466_v63 = vadd.f32 %v1465_v60, %v1464_v58  ;;  %v1821_v0 = vpop.f32.mrb[83].mxu0 }
 0x4aa   :  { %v1197_v1 = vadd.f32 %v1819_v61, %v2404_v10 }
 0x4ac   :  { %v1251_v2 = vmax.f32 %v1197_v1, 0.0 }
 0x4ae   :  { %v1467_v3 = vsel %vm833_vm0, %v1251_v2, 0.0  ;;  %v1823_v4 = vpop.f32.mrb[84].mxu0 }
 0x4af   :  { %v1468_v5 = vadd.f32 %v1467_v3, %v1466_v63  ;;  %v1824_v7 = vpop.f32.mrb[85].mxu0 }
 0x4b0   :  { %v1826_v34 = vpop.f32.mrb[86].mxu0 }
 0x4b1   :  { %v1483_v35 = vrot.slane %v1468_v5, 4  ;;  %v1827_v38 = vpop.f32.mrb[87].mxu0 }
 0x4b3   :  { %v1484_v45 = vadd.f32 %v1483_v35, %v1468_v5 }
 0x4b5   :  { %v1485_v46 = vrot.slane %v1484_v45, 2 }
 0x4b6   :  { %v1829_v6 = vpop.f32.mrb[88].mxu0 }
 0x4b7   :  { %v1486_v8 = vadd.f32 %v1485_v46, %v1484_v45  ;;  %v1830_v48 = vpop.f32.mrb[89].mxu0 }
 0x4b8   :  { %v1832_v49 = vpop.f32.mrb[90].mxu0 }
 0x4b9   :  { %v1487_v51 = vrot.slane %v1486_v8, 1  ;;  %v1833_v53 = vpop.f32.mrb[91].mxu0 }
 0x4bb   :  { %v1488_v9 = vadd.f32 %v1487_v51, %v1486_v8 }
 0x4bd   :  { %1490 = vst.msk [vmem:[%s2465_s6] sm:$0x1] %vm1489_vm1, %v1488_v9 }
 0x4be   :  { %v1835_v10 = vpop.f32.mrb[92].mxu0 }
 0x4bf   :  { %v1836_v11 = vpop.f32.mrb[93].mxu0 }
 0x4c0   :  { %v1838_v12 = vpop.f32.mrb[94].mxu0 }
 0x4c1   :  { %v1839_v13 = vpop.f32.mrb[95].mxu0 }

</bundles_post_ra>
